<compile_context>
chip_gen: v6e
topology: v6e:2x2x1
jax: 0.10.0
libtpu: 0.0.40
codegen_flags: <defaults>
</compile_context>

<pallas_src>
import functools
import math

import jax
import jax.numpy as jnp
from jax.experimental import pallas as pl
from jax.experimental.pallas import tpu as pltpu

_LOG_CLAMP = -100.0  # matches torch.nn.functional.binary_cross_entropy


def _fold_tile(x, acc_width):
    """(tb, tc) f32 -> (8, acc_width) partial sum.

    Uses only statically aligned slices (rows in groups of 8, lanes in groups
    of acc_width, a multiple of 128), so every add is a plain vreg-wise VPU add
    with no relayout and no cross-lane/sublane reduction.
    Requires tb % 8 == 0 and tc % acc_width == 0 (guaranteed by the wrapper).
    """
    tb, tc = x.shape
    rows = x[0:8, :]
    for r in range(8, tb, 8):
        rows = rows + x[r:r + 8, :]
    out = rows[:, 0:acc_width]
    for c in range(acc_width, tc, acc_width):
        out = out + rows[:, c:c + acc_width]
    return out


def _supervision_loss_kernel(ccam_ref, cam_ref, sum_ref, cnt_ref, *,
                             high, low, n_rows, n_cols, n_col_blocks,
                             cols_per_split, n_col_splits, acc_width):
    p_id = pl.program_id(0)          # parallel shard (row-block x col-split)
    j = pl.program_id(1)             # inner reduction step (column blocks)

    @pl.when(j == 0)
    def _init():
        sum_ref[...] = jnp.zeros_like(sum_ref)
        cnt_ref[...] = jnp.zeros_like(cnt_ref)

    tb, tc = cam_ref.shape

    # Recover which (row block, column block) this step covers.  The index_map
    # clamps overflowing column-block indices to the last block; we zero those
    # contributions here instead (at most n_col_splits-1 wasted steps).
    if n_col_splits == 1:
        row_blk = p_id
        cb = j
    else:
        row_blk = p_id // n_col_splits
        cb = (p_id % n_col_splits) * cols_per_split + j
    cb_clamped = jnp.minimum(cb, n_col_blocks - 1)
    col0 = cb_clamped * tc
    row0 = row_blk * tb

    cam = cam_ref[...]                          # native dtype (bf16 stays bf16)
    p = ccam_ref[...].astype(jnp.float32)       # f32 only for the log

    fg = cam > high
    bg = cam < low

    # In-bounds masks for ragged tails / block overhang (no host-side pad).
    row_in = (row0 + jax.lax.broadcasted_iota(jnp.int32, (tb, 1), 0)) < n_rows
    col_in = (col0 + jax.lax.broadcasted_iota(jnp.int32, (1, tc), 1)) < n_cols
    inb = jnp.logical_and(row_in, col_in)
    if n_col_splits > 1:
        inb = jnp.logical_and(inb, cb < n_col_blocks)

    valid = jnp.logical_and(jnp.logical_or(fg, bg), inb)

    # Single-log BCE: fg -> -log(p); valid & ~fg (i.e. bg) -> -log(1-p).
    logv = jnp.maximum(jnp.log(jnp.where(fg, p, 1.0 - p)), _LOG_CLAMP)
    elem = jnp.where(valid, -logv, 0.0)
    validf = valid.astype(jnp.float32)

    sum_ref[...] += _fold_tile(elem, acc_width)[None]
    cnt_ref[...] += _fold_tile(validf, acc_width)[None]


def _round_up(x, m):
    return (x + m - 1) // m * m


def _chip_budgets():
    """(per-input block byte budget, vmem_limit_bytes), chip-generation aware."""
    try:
        vmem = pltpu.get_tpu_info().vmem_capacity_bytes
    except Exception:
        vmem = 64 * 1024 * 1024
    if vmem >= 96 * 1024 * 1024:                 # v5e / v6e: 128 MiB VMEM
        return 4 * 1024 * 1024, 96 * 1024 * 1024
    return 2 * 1024 * 1024, 48 * 1024 * 1024     # v7x: 64 MiB VMEM


def supervision_loss(ccam, initial_cam, high_threshold=0.8, low_threshold=0.1):
    """ccam, initial_cam: (B, 1, H, W) probability maps. Returns scalar loss.

    bf16 inputs are supported (and halve HBM traffic); the cast to f32 happens
    on the VMEM tile inside the kernel.
    """
    assert ccam.shape == initial_cam.shape
    B = ccam.shape[0]
    hw = math.prod(ccam.shape[1:])

    # Lane-dense views; no constant padding (tails are masked in-kernel).
    p2 = ccam.reshape(B, hw)
    cam2 = initial_cam.reshape(B, hw)

    itemsize = max(p2.dtype.itemsize, cam2.dtype.itemsize)
    block_budget, vmem_limit = _chip_budgets()

    # Row block: multiple of 8 sublanes (overhang rows are masked).
    tb = min(_round_up(B, 8), 64)
    # Column block: multiple of 128 lanes, bounded by the per-input budget.
    tc_cap = max(128, (block_budget // (tb * itemsize)) // 128 * 128)
    tc = min(_round_up(hw, 128), tc_cap)
    acc_w = 2048
    if tc > acc_w:
        tc = (tc // acc_w) * acc_w   # keep acc_w | tc
    else:
        acc_w = tc

    n_row_blocks = pl.cdiv(B, tb)
    n_col_blocks = pl.cdiv(hw, tc)
    # Expose >=2 parallel shards for v7x's two TensorCores when the batch
    # alone gives only one row block.  Harmless on 1-TC chips.
    n_col_splits = 2 if (n_row_blocks == 1 and n_col_blocks >= 2) else 1
    cols_per_split = pl.cdiv(n_col_blocks, n_col_splits)
    num_shards = n_row_blocks * n_col_splits
    grid = (num_shards, cols_per_split)

    if n_col_splits == 1:
        in_map = lambda p, j: (p, j)
    else:
        def in_map(p, j):
            cb = (p % n_col_splits) * cols_per_split + j
            return (p // n_col_splits, jnp.minimum(cb, n_col_blocks - 1))

    out_map = lambda p, j: (p, 0, 0)

    kernel = functools.partial(
        _supervision_loss_kernel,
        high=float(high_threshold), low=float(low_threshold),
        n_rows=B, n_cols=hw, n_col_blocks=n_col_blocks,
        cols_per_split=cols_per_split, n_col_splits=n_col_splits,
        acc_width=acc_w)

    n_elems = B * hw
    cost = pl.CostEstimate(
        flops=12 * n_elems,
        transcendentals=n_elems,
        bytes_accessed=n_elems * (p2.dtype.itemsize + cam2.dtype.itemsize)
        + 2 * num_shards * 8 * acc_w * 4)

    sums, cnts = pl.pallas_call(
        kernel,
        out_shape=(jax.ShapeDtypeStruct((num_shards, 8, acc_w), jnp.float32),
                   jax.ShapeDtypeStruct((num_shards, 8, acc_w), jnp.float32)),
        grid_spec=pltpu.PrefetchScalarGridSpec(
            num_scalar_prefetch=0,
            grid=grid,
            in_specs=[pl.BlockSpec((tb, tc), in_map),
                      pl.BlockSpec((tb, tc), in_map)],
            out_specs=(pl.BlockSpec((1, 8, acc_w), out_map),
                       pl.BlockSpec((1, 8, acc_w), out_map))),
        compiler_params=pltpu.CompilerParams(
            dimension_semantics=("parallel", "arbitrary"),
            vmem_limit_bytes=vmem_limit),
        cost_estimate=cost,
    )(p2, cam2)

    # Tiny epilogue on per-shard partials (branchless "no valid pixel" case).
    total = jnp.sum(sums)
    count = jnp.sum(cnts)
    return jnp.where(count > 0.0, total / count, jnp.float32(0.0))


def supervision_loss_reference(ccam, initial_cam, high=0.8, low=0.1):
    """Pure-JAX reference reproducing the PyTorch forward."""
    fg = initial_cam > high
    bg = initial_cam < low
    valid = jnp.logical_or(fg, bg)
    target = jnp.where(fg, 1.0, 0.0)
    p = ccam.astype(jnp.float32)
    log_p = jnp.maximum(jnp.log(p), _LOG_CLAMP)
    log_not_p = jnp.maximum(jnp.log(1.0 - p), _LOG_CLAMP)
    elem = -(target * log_p + (1.0 - target) * log_not_p)
    count = jnp.sum(valid)
    total = jnp.sum(jnp.where(valid, elem, 0.0))
    return jnp.where(count > 0, total / count, 0.0)


if __name__ == "__main__":
    key = jax.random.PRNGKey(0)
    k1, k2 = jax.random.split(key)

    B, H, W = 2, 16, 16
    # ccam: single-channel probability map in (0,1); initial_cam in [0,1].
    ccam = jax.nn.sigmoid(2.0 * jax.random.normal(k1, (B, 1, H, W), jnp.float32))
    initial_cam = jax.random.uniform(k2, (B, 1, H, W), dtype=jnp.float32)

    loss = supervision_loss(ccam, initial_cam)
    jax.block_until_ready(loss)

    loss_ref = supervision_loss_reference(ccam, initial_cam)
    assert loss.shape == ()
    assert jnp.allclose(loss, loss_ref, atol=1e-5, rtol=1e-5), (loss, loss_ref)

    # Degenerate case: no pixel above 0.8 or below 0.1 -> loss is exactly 0.
    flat_cam = jnp.full((B, 1, H, W), 0.5, jnp.float32)
    loss0 = supervision_loss(ccam, flat_cam)
    jax.block_until_ready(loss0)
    assert jnp.allclose(loss0, 0.0), loss0

    print("KERNEL_OK")
</pallas_src>

<mosaic_0001>
module attributes {stable_mosaic.version = 11 : i64} {
  func.func @_supervision_loss_kernel(%arg0: i32, %arg1: i32, %arg2: memref<8x256xf32, #tpu.memory_space<vmem>>, %arg3: memref<8x256xf32, #tpu.memory_space<vmem>>, %arg4: memref<1x8x256xf32, #tpu.memory_space<vmem>>, %arg5: memref<1x8x256xf32, #tpu.memory_space<vmem>>) attributes {dimension_semantics = [#tpu.dimension_semantics<parallel>, #tpu.dimension_semantics<arbitrary>], iteration_bounds = array<i64: 1, 1>, scalar_prefetch = 0 : i64, scratch_operands = 0 : i64, tpu.core_type = #tpu.core_type<tc>, window_params = [{transform_indices = @transform_0, window_bounds = array<i64: 8, 256>}, {transform_indices = @transform_1, window_bounds = array<i64: 8, 256>}, {transform_indices = @transform_2, window_bounds = array<i64: 1, 8, 256>}, {transform_indices = @transform_3, window_bounds = array<i64: 1, 8, 256>}]} {
    %c0_i32 = arith.constant 0 : i32
    %0 = arith.cmpi eq, %arg1, %c0_i32 : i32
    %1 = arith.extui %0 : i1 to i32
    %c0_i32_0 = arith.constant 0 : i32
    %2 = arith.cmpi ne, %1, %c0_i32_0 : i32
    scf.if %2 {
      %cst_23 = arith.constant 0.000000e+00 : f32
      %47 = vector.broadcast %cst_23 : f32 to vector<1x8x256xf32>
      %c0_24 = arith.constant 0 : index
      %c0_25 = arith.constant 0 : index
      %c0_26 = arith.constant 0 : index
      %48 = vector.load %arg4[%c0_24, %c0_25, %c0_26] : memref<1x8x256xf32, #tpu.memory_space<vmem>>, vector<1x8x256xf32>
      tpu.vector_store %arg4[%c0_24, %c0_25, %c0_26], %47 {strides = array<i32>} : memref<1x8x256xf32, #tpu.memory_space<vmem>>, vector<1x8x256xf32>,
      %cst_27 = arith.constant 0.000000e+00 : f32
      %49 = vector.broadcast %cst_27 : f32 to vector<1x8x256xf32>
      %c0_28 = arith.constant 0 : index
      %c0_29 = arith.constant 0 : index
      %c0_30 = arith.constant 0 : index
      %50 = vector.load %arg5[%c0_28, %c0_29, %c0_30] : memref<1x8x256xf32, #tpu.memory_space<vmem>>, vector<1x8x256xf32>
      tpu.vector_store %arg5[%c0_28, %c0_29, %c0_30], %49 {strides = array<i32>} : memref<1x8x256xf32, #tpu.memory_space<vmem>>, vector<1x8x256xf32>,
    } else {
    }
    %c0_i32_1 = arith.constant 0 : i32
    %3 = arith.minsi %arg1, %c0_i32_1 : i32
    %c256_i32 = arith.constant 256 : i32
    %4 = arith.muli %3, %c256_i32 : i32
    %c8_i32 = arith.constant 8 : i32
    %5 = arith.muli %arg0, %c8_i32 : i32
    %c0 = arith.constant 0 : index
    %c0_2 = arith.constant 0 : index
    %6 = vector.load %arg3[%c0, %c0_2] : memref<8x256xf32, #tpu.memory_space<vmem>>, vector<8x256xf32>
    %c0_3 = arith.constant 0 : index
    %c0_4 = arith.constant 0 : index
    %7 = vector.load %arg2[%c0_3, %c0_4] : memref<8x256xf32, #tpu.memory_space<vmem>>, vector<8x256xf32>
    %cst = arith.constant 8.000000e-01 : f32
    %8 = vector.broadcast %cst : f32 to vector<8x256xf32>
    %9 = arith.cmpf ogt, %6, %8 : vector<8x256xf32>
    %cst_5 = arith.constant 1.000000e-01 : f32
    %10 = vector.broadcast %cst_5 : f32 to vector<8x256xf32>
    %11 = arith.cmpf olt, %6, %10 : vector<8x256xf32>
    %12 = tpu.iota {dimensions = array<i32: 0>} : vector<8x1xi32>
    %13 = vector.broadcast %5 : i32 to vector<8x1xi32>
    %14 = arith.addi %13, %12 : vector<8x1xi32>
    %c2_i32 = arith.constant 2 : i32
    %15 = vector.broadcast %c2_i32 : i32 to vector<8x1xi32>
    %16 = arith.cmpi slt, %14, %15 : vector<8x1xi32>
    %17 = tpu.iota {dimensions = array<i32: 1>} : vector<1x256xi32>
    %18 = vector.broadcast %4 : i32 to vector<1x256xi32>
    %19 = arith.addi %18, %17 : vector<1x256xi32>
    %c256_i32_6 = arith.constant 256 : i32
    %20 = vector.broadcast %c256_i32_6 : i32 to vector<1x256xi32>
    %21 = arith.cmpi slt, %19, %20 : vector<1x256xi32>
    %22 = vector.broadcast %16 : vector<8x1xi1> to vector<8x256xi1>
    %23 = vector.broadcast %21 : vector<1x256xi1> to vector<8x256xi1>
    %24 = arith.andi %22, %23 : vector<8x256xi1>
    %25 = arith.ori %9, %11 : vector<8x256xi1>
    %26 = arith.andi %25, %24 : vector<8x256xi1>
    %cst_7 = arith.constant 1.000000e+00 : f32
    %27 = vector.broadcast %cst_7 : f32 to vector<8x256xf32>
    %28 = arith.subf %27, %7 : vector<8x256xf32>
    %29 = arith.select %9, %7, %28 : vector<8x256xi1>, vector<8x256xf32>
    %30 = math.log %29 : vector<8x256xf32>
    %cst_8 = arith.constant -1.000000e+02 : f32
    %31 = vector.broadcast %cst_8 : f32 to vector<8x256xf32>
    %32 = arith.maximumf %30, %31 : vector<8x256xf32>
    %cst_9 = arith.constant 0.000000e+00 : f32
    %33 = vector.broadcast %cst_9 : f32 to vector<8x256xf32>
    %34 = arith.subf %33, %32 : vector<8x256xf32>
    %cst_10 = arith.constant 0.000000e+00 : f32
    %35 = vector.broadcast %cst_10 : f32 to vector<8x256xf32>
    %36 = arith.select %26, %34, %35 : vector<8x256xi1>, vector<8x256xf32>
    %37 = arith.extui %26 : vector<8x256xi1> to vector<8x256xi32>
    %38 = arith.sitofp %37 : vector<8x256xi32> to vector<8x256xf32>
    %c0_11 = arith.constant 0 : index
    %c0_12 = arith.constant 0 : index
    %c0_13 = arith.constant 0 : index
    %39 = vector.load %arg4[%c0_11, %c0_12, %c0_13] : memref<1x8x256xf32, #tpu.memory_space<vmem>>, vector<1x8x256xf32>
    %40 = vector.shape_cast %36 : vector<8x256xf32> to vector<1x8x256xf32>
    %41 = arith.addf %39, %40 : vector<1x8x256xf32>
    %c0_14 = arith.constant 0 : index
    %c0_15 = arith.constant 0 : index
    %c0_16 = arith.constant 0 : index
    %42 = vector.load %arg4[%c0_14, %c0_15, %c0_16] : memref<1x8x256xf32, #tpu.memory_space<vmem>>, vector<1x8x256xf32>
    tpu.vector_store %arg4[%c0_14, %c0_15, %c0_16], %41 {strides = array<i32>} : memref<1x8x256xf32, #tpu.memory_space<vmem>>, vector<1x8x256xf32>,
    %c0_17 = arith.constant 0 : index
    %c0_18 = arith.constant 0 : index
    %c0_19 = arith.constant 0 : index
    %43 = vector.load %arg5[%c0_17, %c0_18, %c0_19] : memref<1x8x256xf32, #tpu.memory_space<vmem>>, vector<1x8x256xf32>
    %44 = vector.shape_cast %38 : vector<8x256xf32> to vector<1x8x256xf32>
    %45 = arith.addf %43, %44 : vector<1x8x256xf32>
    %c0_20 = arith.constant 0 : index
    %c0_21 = arith.constant 0 : index
    %c0_22 = arith.constant 0 : index
    %46 = vector.load %arg5[%c0_20, %c0_21, %c0_22] : memref<1x8x256xf32, #tpu.memory_space<vmem>>, vector<1x8x256xf32>
    tpu.vector_store %arg5[%c0_20, %c0_21, %c0_22], %45 {strides = array<i32>} : memref<1x8x256xf32, #tpu.memory_space<vmem>>, vector<1x8x256xf32>,
    return
  }
  func.func @transform_0(%arg0: i32, %arg1: i32) -> (i32, i32) {
    %c0_i32 = arith.constant 0 : i32
    return %arg0, %arg1 : i32, i32
  }
  func.func @transform_1(%arg0: i32, %arg1: i32) -> (i32, i32) {
    %c0_i32 = arith.constant 0 : i32
    return %arg0, %arg1 : i32, i32
  }
  func.func @transform_2(%arg0: i32, %arg1: i32) -> (i32, i32, i32) {
    %c0_i32 = arith.constant 0 : i32
    %c0_i32_0 = arith.constant 0 : i32
    %c0_i32_1 = arith.constant 0 : i32
    return %arg0, %c0_i32, %c0_i32_0 : i32, i32, i32
  }
  func.func @transform_3(%arg0: i32, %arg1: i32) -> (i32, i32, i32) {
    %c0_i32 = arith.constant 0 : i32
    %c0_i32_0 = arith.constant 0 : i32
    %c0_i32_1 = arith.constant 0 : i32
    return %arg0, %c0_i32, %c0_i32_0 : i32, i32, i32
  }
}

</mosaic_0001>

<bundles_post_ra>
// kernel: tpu_custom_call.1
= control target key start
LH: loop header
LB: loop body
LE: loop exit
PB: predicated region body
PF: predicated region fallthrough
CT: control target
= control target key end

     0   :  { %9 = vsyncpa [#allocation3], 0  ;;  %s486_s0 = inlined_call_operand.hbm [shape: f32[2,256], index: 0, kind: input, shape index: {}]   ;;  %s487_s1 = inlined_call_operand.hbm [shape: f32[2,256], index: 1, kind: input, shape index: {}]   ;;  %s488_s2 = inlined_call_operand.hbm [shape: f32[1,8,256], index: 2, kind: output, shape index: {0}]   ;;  %s489_s3 = inlined_call_operand.hbm [shape: f32[1,8,256], index: 3, kind: output, shape index: {1}]  }
   0x1   :  { %10 = vsyncpa [#allocation6], 0 }
   0x2   :  { %11 = vsyncpa [#allocation4], 0 }
   0x3   :  { %12 = vsyncpa [#allocation9], 0 }
   0x4   :  { %17 = vsyncadd [#allocation3], 192  ;;  %s357_s12 = smov [#allocation2]  }
   0x5   :  { %s18_s13 = sshll.u32 %s357_s12, 4  ;;  %s19_s13 = int_to_ptr.vmem [resolvable:$true] %s18_s13 }
   0x6   :  { %s277_s14 = scalar_lea.vmem %s19_s13, 64  ;;  %s281_s15 = scalar_lea.vmem %s19_s13, 256 }
   0x7   :  { %p278_p0 = scmp.ne.s32.totalorder %s19_s13, %s277_s14  ;;  %p282_p1 = scmp.lt.s32.totalorder %s19_s13, %s19_s13 }
   0x8   :  { %p283_p2 = scmp.lt.s32.totalorder %s281_s15, %s277_s14 }
   0xa   :  { %p284_p3 = por %p283_p2, %p282_p1 }
   0xc   :  { %p285_p4 = pnand %p284_p3, %p278_p0 }
   0xe   :  { %288 = shalt.err (!%p285_p4)
}
   0xf   :  { %s358_s16 = smov 64   ;;  %s359_s17 = smov 4  }
  0x10   :  { %24 = dma.hbm_to_vmem [thread:$0]  %s486_s0, 64, %s19_s13, [#allocation3], %s358_s16, %s358_s16, %s359_s17  }
  0x11   :  { %29 = vsyncadd [#allocation6], 192  ;;  %s360_s20 = smov [#allocation5]  }
  0x12   :  { %s30_s21 = sshll.u32 %s360_s20, 4  ;;  %s31_s21 = int_to_ptr.vmem [resolvable:$true] %s30_s21 }
  0x13   :  { %s297_s22 = scalar_lea.vmem %s31_s21, 64  ;;  %s301_s23 = scalar_lea.vmem %s31_s21, 256 }
  0x14   :  { %p298_p5 = scmp.ne.s32.totalorder %s31_s21, %s297_s22  ;;  %p302_p6 = scmp.lt.s32.totalorder %s31_s21, %s31_s21 }
  0x15   :  { %p303_p7 = scmp.lt.s32.totalorder %s301_s23, %s297_s22 }
  0x17   :  { %p304_p8 = por %p303_p7, %p302_p6 }
  0x19   :  { %p305_p9 = pnand %p304_p8, %p298_p5 }
  0x1b   :  { %308 = shalt.err (!%p305_p9)
}
  0x1c   :  { %36 = dma.hbm_to_vmem [thread:$0]  %s487_s1, 64, %s31_s21, [#allocation6], %s358_s16, %s358_s16, %s359_s17  }
  0x1d   :  { %349 = dma.done.wait [#allocation3], 256  }
  0x1e   :  { %350 = vsyncadd [#allocation3], 4294967040 }
  0x1f   :  { %351 = dma.done.wait [#allocation6], 256  }
  0x20   :  { %352 = vsyncadd [#allocation6], 4294967040  ;;  %v69_v0 = vlaneseq  ;;  %v361_v1 = vmov 1983009808   ;;  %v362_v5 = vmov 0   ;;  %v363_v37 = vmov 0.0  }
  0x21   :  { %v99_v2 = vunpack.c.l.s4 %v361_v1  ;;  %v53_v10 = vld [vmem:[#allocation5] sm:$0xf]  ;;  %v54_v11 = vld [vmem:[#allocation5 + $0x4] sm:$0xf]  ;;  %v55_v12 = vld [vmem:[#allocation5 + $0x8] sm:$0xf] }
  0x22   :  { %v70_v3 = vshrl.u32 %v69_v0, 7  ;;  %v56_v13 = vld [vmem:[#allocation5 + $0xc] sm:$0xf]  ;;  %v57_v16 = vld [vmem:[#allocation2] sm:$0xf]  ;;  %s364_s0 = smov [#allocation8]  }
  0x23   :  { %v100_v4 = vunpack.c.0.s8 %v99_v2  ;;  %v58_v17 = vld [vmem:[#allocation2 + $0x4] sm:$0xf]  ;;  %v59_v18 = vld [vmem:[#allocation2 + $0x8] sm:$0xf]  ;;  %v60_v19 = vld [vmem:[#allocation2 + $0xc] sm:$0xf] }
  0x24   :  { %vm73_vm0 = vcmp.lt.s32.totalorder %v70_v3, 2  ;;  %vm61_vm1 = vcmp.gt.f32.partialorder %v53_v10, 0.8  ;;  %vm62_vm2 = vcmp.gt.f32.partialorder %v54_v11, 0.8  ;;  %v122_v24 = vsub.f32 1.0, %v57_v16 }
  0x25   :  { %v94_v6 = vsel %vm73_vm0, 1, %v362_v5  ;;  %v392_v7 = vsub.s32 %v100_v4, %v70_v3  ;;  %vm65_vm3 = vcmp.lt.f32.partialorder %v53_v10, 0.1  ;;  %vm66_vm4 = vcmp.lt.f32.partialorder %v54_v11, 0.1  ;;  %s234_s1 = sshll.u32 %s364_s0, 4  ;;  %s235_s1 = int_to_ptr.vmem [resolvable:$true] %s234_s1 }
  0x26   :  { %v96_v8 = vcombine.low %v94_v6, %v94_v6  ;;  %v97_v9 = vcombine.high %v94_v6, %v94_v6  ;;  %vm67_vm5 = vcmp.lt.f32.partialorder %v55_v12, 0.1  ;;  %vm63_vm6 = vcmp.gt.f32.partialorder %v55_v12, 0.8  ;;  %vm397_vm9 = vmor %vm61_vm1, %vm65_vm3  ;;  %s309_s26 = scalar_lea.vmem %s235_s1, 256  ;;  %p314_p11 = scmp.lt.s32.totalorder %s235_s1, %s235_s1 }
  0x27   :  { %vm64_vm7 = vcmp.gt.f32.partialorder %v56_v13, 0.8  ;;  %vm68_vm8 = vcmp.lt.f32.partialorder %v56_v13, 0.1  ;;  %vm402_vm10 = vmor %vm62_vm2, %vm66_vm4  ;;  %v123_v25 = vsub.f32 1.0, %v58_v17  ;;  %v124_v26 = vsub.f32 1.0, %v59_v18  ;;  %p310_p10 = scmp.ne.s32.totalorder %s235_s1, %s309_s26  ;;  %p315_p12 = scmp.lt.s32.totalorder %s309_s26, %s309_s26 }
  0x28   :  { %v104_v14 = vrot.slane %v96_v8, %v392_v7  ;;  %v111_v15 = vrot.slane %v97_v9, %v392_v7  ;;  %vm407_vm12 = vmor %vm63_vm6, %vm67_vm5  ;;  %v125_v29 = vsub.f32 1.0, %v60_v19  ;;  %v126_v31 = vsel %vm61_vm1, %v57_v16, %v122_v24 }
  0x29   :  { %vm416_vm14 = vmor %vm64_vm7, %vm68_vm8  ;;  %v127_v32 = vsel %vm62_vm2, %v58_v17, %v123_v25  ;;  %v128_v33 = vsel %vm63_vm6, %v59_v18, %v124_v26  ;;  %261 = vlog2.f32 %v126_v31  ;;  %p316_p13 = por %p315_p12, %p314_p11 }
  0x2a   :  { %v112_v20 = vcombine.high %v104_v14, %v104_v14  ;;  %v113_v22 = vcombine.high %v111_v15, %v111_v15  ;;  %vm114_vm11 = vcmp.ne.s32.totalorder %v104_v14, 0  ;;  %vm116_vm15 = vcmp.ne.s32.totalorder %v111_v15, 0 }
  0x2b   :  { %vm429_vm3 = vmand %vm397_vm9, %vm114_vm11  ;;  %v129_v36 = vsel %vm64_vm7, %v60_v19, %v125_v29  ;;  %263 = vlog2.f32 %v127_v32  ;;  %p317_p0 = pnand %p316_p13, %p310_p10 }
  0x2c   :  { %vm411_vm13 = vcmp.ne.s32.totalorder %v112_v20, 0  ;;  %vm423_vm0 = vcmp.ne.s32.totalorder %v113_v22, 0  ;;  %v248_v38 = vsel %vm429_vm3, 1.0, %v363_v37  ;;  %vm442_vm2 = vmand %vm407_vm12, %vm116_vm15  ;;  %265 = vlog2.f32 %v128_v33 }
  0x2d   :  { %vm119_vm1 = vmand %vm402_vm10, %vm411_vm13  ;;  %267 = vlog2.f32 %v129_v36  ;;  %v250_v41 = vsel %vm442_vm2, 1.0, %v363_v37 }
  0x2e   :  { %v249_v40 = vsel %vm119_vm1, 1.0, %v363_v37  ;;  %vm121_vm4 = vmand %vm416_vm14, %vm423_vm0 }
  0x2f   :  { %v194_v42 = vcombine.low %v248_v38, %v249_v40  ;;  %v251_v43 = vsel %vm121_vm4, 1.0, %v363_v37 }
  0x30   :  { %v195_v44 = vcombine.low %v250_v41, %v251_v43 }
  0x31   :  { %v202_v45 = vrot.slane %v194_v42, %v392_v7 }
  0x32   :  { %v209_v46 = vrot.slane %v195_v44, %v392_v7 }
  0x34   :  { %v210_v47 = vcombine.low %v202_v45, %v209_v46  ;;  %v211_v48 = vcombine.high %v202_v45, %v209_v46 }
  0x36   :  { %v262_v49 = vpop.eup %261  ;;  %216 = vst [vmem:[#allocation8] sm:$0xff] %v210_v47  ;;  %217 = vst [vmem:[#allocation8 + $0x8] sm:$0xff] %v211_v48 }
  0x37   :  { %v131_v51 = vmul.f32 0.6931472, %v262_v49 }
  0x38   :  { %v264_v50 = vpop.eup %263 }
  0x39   :  { %320 = shalt.err (!%p317_p0)
}
  0x3a   :  { %237 = dma.vmem_to_hbm [thread:$0]  %s235_s1, 256, %s489_s3, [#allocation9]   ;;  %v266_v52 = vpop.eup %265  ;;  %v133_v53 = vmul.f32 0.6931472, %v264_v50  ;;  %v138_v56 = vmax.f32 %v131_v51, -100.0 }
  0x3b   :  { %v268_v54 = vpop.eup %267  ;;  %v135_v55 = vmul.f32 0.6931472, %v266_v52  ;;  %s365_s3 = smov [#allocation7]  }
  0x3c   :  { %v137_v57 = vmul.f32 0.6931472, %v268_v54  ;;  %v139_v58 = vmax.f32 %v133_v53, -100.0  ;;  %v142_v60 = vsub.f32 0.0, %v138_v56  ;;  %s224_s29 = sshll.u32 %s365_s3, 4  ;;  %s225_s29 = int_to_ptr.vmem [resolvable:$true] %s224_s29 }
  0x3d   :  { %v140_v59 = vmax.f32 %v135_v55, -100.0  ;;  %s329_s30 = scalar_lea.vmem %s225_s29, 256  ;;  %p334_p2 = scmp.lt.s32.totalorder %s225_s29, %s225_s29 }
  0x3e   :  { %v141_v61 = vmax.f32 %v137_v57, -100.0  ;;  %v143_v62 = vsub.f32 0.0, %v139_v58  ;;  %v146_v0 = vsel %vm429_vm3, %v142_v60, 0.0  ;;  %p330_p1 = scmp.ne.s32.totalorder %s225_s29, %s329_s30  ;;  %p335_p3 = scmp.lt.s32.totalorder %s329_s30, %s329_s30 }
  0x3f   :  { %v144_v63 = vsub.f32 0.0, %v140_v59 }
  0x40   :  { %v145_v1 = vsub.f32 0.0, %v141_v61  ;;  %v147_v2 = vsel %vm119_vm1, %v143_v62, 0.0  ;;  %p336_p4 = por %p335_p3, %p334_p2 }
  0x41   :  { %v148_v3 = vsel %vm442_vm2, %v144_v63, 0.0  ;;  %v164_v4 = vcombine.low %v146_v0, %v147_v2 }
  0x42   :  { %v149_v5 = vsel %vm121_vm4, %v145_v1, 0.0  ;;  %p337_p5 = pnand %p336_p4, %p330_p1 }
  0x43   :  { %v165_v6 = vcombine.low %v148_v3, %v149_v5  ;;  %v172_v8 = vrot.slane %v164_v4, %v392_v7 }
  0x45   :  { %v179_v9 = vrot.slane %v165_v6, %v392_v7 }
  0x47   :  { %v180_v10 = vcombine.low %v172_v8, %v179_v9  ;;  %v181_v11 = vcombine.high %v172_v8, %v179_v9 }
  0x49   :  { %186 = vst [vmem:[#allocation7] sm:$0xff] %v180_v10  ;;  %187 = vst [vmem:[#allocation7 + $0x8] sm:$0xff] %v181_v11 }
  0x4a   :  { %340 = shalt.err (!%p337_p5)
}
  0x4b   :  { %227 = dma.vmem_to_hbm [thread:$0]  %s225_s29, 256, %s488_s2, [#allocation4]  }
  0x4c   :  { %353 = dma.done.wait [#allocation4], 256  }
  0x4d   :  { %354 = vsyncadd [#allocation4], 4294967040 }
  0x4e   :  { %355 = dma.done.wait [#allocation9], 256  }
  0x4f   :  { %356 = vsyncadd [#allocation9], 4294967040 }
  0x50   :  { %244 = vsyncpa [#allocation3], 1 }
  0x51   :  { %245 = vsyncpa [#allocation6], 1 }
  0x52   :  { %246 = vsyncpa [#allocation4], 1 }
  0x53   :  { %247 = vsyncpa [#allocation9], 1 }

</bundles_post_ra>
